<compile_context>
chip_gen: v6e
topology: v6e:2x2x1
jax: 0.10.0
libtpu: 0.0.40
codegen_flags: <defaults>
</compile_context>

<pallas_src>
import functools

import jax
import jax.numpy as jnp
from jax.experimental import pallas as pl
from jax.experimental.pallas import tpu as pltpu


def _attention_kernel(x_ref, wqkv_ref, wp_ref, bp_ref, o_ref,
                      q_s, k_s, v_s, ctx_s, *, num_heads, scale, block_q):
    """One (batch element, query tile) per grid step.

    x_ref    : (1, N, C)   full token sequence for this batch element
    wqkv_ref : (C, 3C)     packed q|k|v projection weight (input-major)
    wp_ref   : (C, C)      output projection weight (input-major)
    bp_ref   : (1, C)      output projection bias
    o_ref    : (1, tq, C)  output tile
    q_s/k_s/v_s : (H, N, Dh) VMEM scratch, head-major projections
    ctx_s    : (tq, C)     VMEM scratch, lane-dense per-tile context
    """
    qi = pl.program_id(1)
    _, N, C = x_ref.shape
    H = num_heads
    Dh = C // H
    compute_dtype = x_ref.dtype

    # ---- per batch element: fused QKV projection (first query tile only) ----
    @pl.when(qi == 0)
    def _project_qkv():
        x = x_ref[0]                                                    # (N, C)
        qkv = jnp.dot(x, wqkv_ref[...],
                      preferred_element_type=jnp.float32)               # (N, 3C), f32 accum
        q2 = (qkv[:, 0 * C:1 * C] * scale).astype(compute_dtype)        # scale folded into q
        k2 = qkv[:, 1 * C:2 * C].astype(compute_dtype)
        v2 = qkv[:, 2 * C:3 * C].astype(compute_dtype)
        # Head-major scatter into scratch (pure data movement, once per batch).
        for h in range(H):
            sl = slice(h * Dh, (h + 1) * Dh)
            q_s[h] = q2[:, sl]
            k_s[h] = k2[:, sl]
            v_s[h] = v2[:, sl]

    # ---- attention for this query tile, all heads batched on the MXU ----
    q0 = pl.multiple_of(qi * block_q, block_q)
    q_t = q_s[:, pl.ds(q0, block_q), :]                                  # (H, tq, Dh)
    k = k_s[...]                                                         # (H, N, Dh)
    v = v_s[...]                                                         # (H, N, Dh)

    s = jnp.einsum('hqd,hkd->hqk', q_t, k,
                   preferred_element_type=jnp.float32)                   # (H, tq, N) f32
    s = s - jnp.max(s, axis=-1, keepdims=True)                           # stable softmax (f32)
    p = jnp.exp(s)                                                       # unnormalized probs <= 1
    denom = jnp.sum(p, axis=-1, keepdims=True)                           # (H, tq, 1)

    ctx = jnp.einsum('hqk,hkd->hqd', p.astype(compute_dtype), v,
                     preferred_element_type=jnp.float32)                 # (H, tq, Dh) f32
    # Normalize AFTER P@V: tq*C multiplies instead of tq*N, reciprocal on EUP.
    ctx = ctx * pl.reciprocal(denom, approx=True)

    # Gather heads into a lane-dense (tq, C) scratch == transpose(1,2).reshape.
    for h in range(H):
        ctx_s[:, h * Dh:(h + 1) * Dh] = ctx[h].astype(compute_dtype)

    # Output projection (with bias), lane-dense store.
    out = jnp.dot(ctx_s[...], wp_ref[...],
                  preferred_element_type=jnp.float32) + bp_ref[...].astype(jnp.float32)
    o_ref[0] = out.astype(o_ref.dtype)


def attention_pallas(x, w_qkv, w_proj, b_proj, *, num_heads, scale, block_q=None):
    B, N, C = x.shape
    assert C % num_heads == 0, "C must be divisible by num_heads"
    head_dim = C // num_heads

    if block_q is None:
        block_q = min(N, 128)
    # Query tile must tile N exactly and keep the output BlockSpec legal
    # (second-to-last block dim multiple of 8, or equal to the full dim).
    if N % block_q != 0 or (block_q != N and block_q % 8 != 0):
        block_q = N
    num_q = N // block_q

    kernel = functools.partial(_attention_kernel, num_heads=num_heads,
                               scale=scale, block_q=block_q)
    compute_dtype = x.dtype

    return pl.pallas_call(
        kernel,
        out_shape=jax.ShapeDtypeStruct((B, N, C), x.dtype),
        grid_spec=pltpu.PrefetchScalarGridSpec(
            num_scalar_prefetch=0,
            grid=(B, num_q),
            in_specs=[
                # Full sequence for this batch element; only re-fetched when b changes.
                pl.BlockSpec((1, N, C), lambda b, q: (b, 0, 0)),
                # Constant weights: fetched once (constant block index).
                pl.BlockSpec((C, 3 * C), lambda b, q: (0, 0)),
                pl.BlockSpec((C, C), lambda b, q: (0, 0)),
                pl.BlockSpec((1, C), lambda b, q: (0, 0)),
            ],
            out_specs=pl.BlockSpec((1, block_q, C), lambda b, q: (b, q, 0)),
            scratch_shapes=[
                pltpu.VMEM((num_heads, N, head_dim), compute_dtype),   # q (pre-scaled)
                pltpu.VMEM((num_heads, N, head_dim), compute_dtype),   # k
                pltpu.VMEM((num_heads, N, head_dim), compute_dtype),   # v
                pltpu.VMEM((block_q, C), compute_dtype),               # gathered context
            ],
        ),
        compiler_params=pltpu.CompilerParams(
            # batch axis parallel (megacore / v7x two TCs), query-tile axis
            # arbitrary because K/V scratch is carried across it.
            dimension_semantics=("parallel", "arbitrary")),
    )(x, w_qkv, w_proj, b_proj)


def attention_ref(x, w_qkv, w_proj, b_proj, *, num_heads, scale):
    """Pure-JAX reference matching the PyTorch module semantics."""
    B, N, C = x.shape
    Dh = C // num_heads
    qkv = (x @ w_qkv).reshape(B, N, 3, num_heads, Dh).transpose(2, 0, 3, 1, 4)
    q, k, v = qkv[0], qkv[1], qkv[2]                 # (B, H, N, Dh)
    attn = jnp.einsum('bhnd,bhmd->bhnm', q, k) * scale
    attn = jax.nn.softmax(attn, axis=-1)
    ctx = jnp.einsum('bhnm,bhmd->bhnd', attn, v)     # (B, H, N, Dh)
    ctx = ctx.transpose(0, 2, 1, 3).reshape(B, N, C)
    return ctx @ w_proj + b_proj


if __name__ == "__main__":
    # Small shapes consistent with the module: B=2, N=8 tokens, C=32 dim,
    # num_heads=8 -> head_dim=4, scale = head_dim**-0.5.
    B, N, C = 2, 8, 32
    num_heads = 8
    head_dim = C // num_heads
    scale = head_dim ** (-0.5)

    key = jax.random.PRNGKey(0)
    kx, kqkv, kp, kb = jax.random.split(key, 4)

    x = jax.random.normal(kx, (B, N, C), dtype=jnp.float32)
    # nn.Linear(dim, 3*dim, bias=False): packed, input-major (C, 3C).
    w_qkv = jax.random.normal(kqkv, (C, 3 * C), dtype=jnp.float32) * 0.1
    # nn.Linear(dim, dim) with bias, input-major.
    w_proj = jax.random.normal(kp, (C, C), dtype=jnp.float32) * 0.1
    b_proj = jax.random.normal(kb, (1, C), dtype=jnp.float32) * 0.1

    # --- float32 path ---
    out = attention_pallas(x, w_qkv, w_proj, b_proj,
                           num_heads=num_heads, scale=scale)
    out = jax.block_until_ready(out)
    ref = attention_ref(x, w_qkv, w_proj, b_proj,
                        num_heads=num_heads, scale=scale)
    assert out.shape == (B, N, C)
    err = float(jnp.max(jnp.abs(out - ref)))
    assert jnp.allclose(out, ref, atol=1e-2, rtol=1e-2), \
        f"f32 mismatch vs reference (max abs err = {err})"

    # --- bfloat16 path (bf16 MXU operands, f32 accumulation & softmax) ---
    xb = x.astype(jnp.bfloat16)
    wqb = w_qkv.astype(jnp.bfloat16)
    wpb = w_proj.astype(jnp.bfloat16)
    bpb = b_proj.astype(jnp.bfloat16)
    out_b = attention_pallas(xb, wqb, wpb, bpb,
                             num_heads=num_heads, scale=scale)
    out_b = jax.block_until_ready(out_b)
    ref_b = attention_ref(xb.astype(jnp.float32), wqb.astype(jnp.float32),
                          wpb.astype(jnp.float32), bpb.astype(jnp.float32),
                          num_heads=num_heads, scale=scale)
    err_b = float(jnp.max(jnp.abs(out_b.astype(jnp.float32) - ref_b)))
    assert jnp.allclose(out_b.astype(jnp.float32), ref_b, atol=5e-2, rtol=5e-2), \
        f"bf16 mismatch vs reference (max abs err = {err_b})"

    print("KERNEL_OK")
</pallas_src>

<mosaic_0001>
module attributes {stable_mosaic.version = 11 : i64} {
  func.func @_attention_kernel(%arg0: i32, %arg1: i32, %arg2: memref<1x8x32xf32, #tpu.memory_space<vmem>>, %arg3: memref<32x96xf32, #tpu.memory_space<vmem>>, %arg4: memref<32x32xf32, #tpu.memory_space<vmem>>, %arg5: memref<1x32xf32, #tpu.memory_space<vmem>>, %arg6: memref<1x8x32xf32, #tpu.memory_space<vmem>>, %arg7: memref<8x8x4xf32, #tpu.memory_space<vmem>>, %arg8: memref<8x8x4xf32, #tpu.memory_space<vmem>>, %arg9: memref<8x8x4xf32, #tpu.memory_space<vmem>>, %arg10: memref<8x32xf32, #tpu.memory_space<vmem>>) attributes {dimension_semantics = [#tpu.dimension_semantics<parallel>, #tpu.dimension_semantics<arbitrary>], iteration_bounds = array<i64: 2, 1>, scalar_prefetch = 0 : i64, scratch_operands = 4 : i64, tpu.core_type = #tpu.core_type<tc>, window_params = [{transform_indices = @transform_0, window_bounds = array<i64: 1, 8, 32>}, {pipeline_mode = #tpu.pipeline_mode<synchronous>, transform_indices = @transform_1, window_bounds = array<i64: 32, 96>}, {pipeline_mode = #tpu.pipeline_mode<synchronous>, transform_indices = @transform_2, window_bounds = array<i64: 32, 32>}, {pipeline_mode = #tpu.pipeline_mode<synchronous>, transform_indices = @transform_3, window_bounds = array<i64: 1, 32>}, {transform_indices = @transform_4, window_bounds = array<i64: 1, 8, 32>}]} {
    %c0_i32 = arith.constant 0 : i32
    %0 = arith.cmpi eq, %arg1, %c0_i32 : i32
    %1 = arith.extui %0 : i1 to i32
    %c0_i32_0 = arith.constant 0 : i32
    %2 = arith.cmpi ne, %1, %c0_i32_0 : i32
    scf.if %2 {
      %c0_30 = arith.constant 0 : index
      %c0_31 = arith.constant 0 : index
      %c0_32 = arith.constant 0 : index
      %54 = vector.load %arg2[%c0_30, %c0_31, %c0_32] : memref<1x8x32xf32, #tpu.memory_space<vmem>>, vector<1x8x32xf32>
      %55 = vector.shape_cast %54 : vector<1x8x32xf32> to vector<8x32xf32>
      %c0_33 = arith.constant 0 : index
      %c0_34 = arith.constant 0 : index
      %56 = vector.load %arg3[%c0_33, %c0_34] : memref<32x96xf32, #tpu.memory_space<vmem>>, vector<32x96xf32>
      %cst_35 = arith.constant dense<0.000000e+00> : vector<8x96xf32>
      %57 = tpu.matmul %55, %56, %cst_35 {dimension_numbers = #tpu.dot_dimension_numbers<[1], [0], [0], [1], [0, 0, 1, 1], [], []>} : vector<8x32xf32>, vector<32x96xf32>, vector<8x96xf32> -> vector<8x96xf32>
      %58 = vector.extract_strided_slice %57 {offsets = [0, 0], sizes = [8, 32], strides = [1, 1]} : vector<8x96xf32> to vector<8x32xf32>
      %cst_36 = arith.constant 5.000000e-01 : f32
      %59 = vector.broadcast %cst_36 : f32 to vector<8x32xf32>
      %60 = arith.mulf %58, %59 : vector<8x32xf32>
      %61 = vector.extract_strided_slice %57 {offsets = [0, 32], sizes = [8, 32], strides = [1, 1]} : vector<8x96xf32> to vector<8x32xf32>
      %62 = vector.extract_strided_slice %57 {offsets = [0, 64], sizes = [8, 32], strides = [1, 1]} : vector<8x96xf32> to vector<8x32xf32>
      %63 = vector.extract_strided_slice %60 {offsets = [0, 0], sizes = [8, 4], strides = [1, 1]} : vector<8x32xf32> to vector<8x4xf32>
      %c0_37 = arith.constant 0 : index
      %c0_38 = arith.constant 0 : index
      %c0_39 = arith.constant 0 : index
      %64 = vector.load %arg7[%c0_37, %c0_38, %c0_39] : memref<8x8x4xf32, #tpu.memory_space<vmem>>, vector<1x8x4xf32>
      %65 = vector.shape_cast %64 : vector<1x8x4xf32> to vector<8x4xf32>
      %66 = vector.shape_cast %63 : vector<8x4xf32> to vector<1x8x4xf32>
      tpu.vector_store %arg7[%c0_37, %c0_38, %c0_39], %66 {strides = array<i32>} : memref<8x8x4xf32, #tpu.memory_space<vmem>>, vector<1x8x4xf32>,
      %67 = vector.extract_strided_slice %61 {offsets = [0, 0], sizes = [8, 4], strides = [1, 1]} : vector<8x32xf32> to vector<8x4xf32>
      %c0_40 = arith.constant 0 : index
      %c0_41 = arith.constant 0 : index
      %c0_42 = arith.constant 0 : index
      %68 = vector.load %arg8[%c0_40, %c0_41, %c0_42] : memref<8x8x4xf32, #tpu.memory_space<vmem>>, vector<1x8x4xf32>
      %69 = vector.shape_cast %68 : vector<1x8x4xf32> to vector<8x4xf32>
      %70 = vector.shape_cast %67 : vector<8x4xf32> to vector<1x8x4xf32>
      tpu.vector_store %arg8[%c0_40, %c0_41, %c0_42], %70 {strides = array<i32>} : memref<8x8x4xf32, #tpu.memory_space<vmem>>, vector<1x8x4xf32>,
      %71 = vector.extract_strided_slice %62 {offsets = [0, 0], sizes = [8, 4], strides = [1, 1]} : vector<8x32xf32> to vector<8x4xf32>
      %c0_43 = arith.constant 0 : index
      %c0_44 = arith.constant 0 : index
      %c0_45 = arith.constant 0 : index
      %72 = vector.load %arg9[%c0_43, %c0_44, %c0_45] : memref<8x8x4xf32, #tpu.memory_space<vmem>>, vector<1x8x4xf32>
      %73 = vector.shape_cast %72 : vector<1x8x4xf32> to vector<8x4xf32>
      %74 = vector.shape_cast %71 : vector<8x4xf32> to vector<1x8x4xf32>
      tpu.vector_store %arg9[%c0_43, %c0_44, %c0_45], %74 {strides = array<i32>} : memref<8x8x4xf32, #tpu.memory_space<vmem>>, vector<1x8x4xf32>,
      %75 = vector.extract_strided_slice %60 {offsets = [0, 4], sizes = [8, 4], strides = [1, 1]} : vector<8x32xf32> to vector<8x4xf32>
      %c1 = arith.constant 1 : index
      %c0_46 = arith.constant 0 : index
      %c0_47 = arith.constant 0 : index
      %76 = vector.load %arg7[%c1, %c0_46, %c0_47] : memref<8x8x4xf32, #tpu.memory_space<vmem>>, vector<1x8x4xf32>
      %77 = vector.shape_cast %76 : vector<1x8x4xf32> to vector<8x4xf32>
      %78 = vector.shape_cast %75 : vector<8x4xf32> to vector<1x8x4xf32>
      tpu.vector_store %arg7[%c1, %c0_46, %c0_47], %78 {strides = array<i32>} : memref<8x8x4xf32, #tpu.memory_space<vmem>>, vector<1x8x4xf32>,
      %79 = vector.extract_strided_slice %61 {offsets = [0, 4], sizes = [8, 4], strides = [1, 1]} : vector<8x32xf32> to vector<8x4xf32>
      %c1_48 = arith.constant 1 : index
      %c0_49 = arith.constant 0 : index
      %c0_50 = arith.constant 0 : index
      %80 = vector.load %arg8[%c1_48, %c0_49, %c0_50] : memref<8x8x4xf32, #tpu.memory_space<vmem>>, vector<1x8x4xf32>
      %81 = vector.shape_cast %80 : vector<1x8x4xf32> to vector<8x4xf32>
      %82 = vector.shape_cast %79 : vector<8x4xf32> to vector<1x8x4xf32>
      tpu.vector_store %arg8[%c1_48, %c0_49, %c0_50], %82 {strides = array<i32>} : memref<8x8x4xf32, #tpu.memory_space<vmem>>, vector<1x8x4xf32>,
      %83 = vector.extract_strided_slice %62 {offsets = [0, 4], sizes = [8, 4], strides = [1, 1]} : vector<8x32xf32> to vector<8x4xf32>
      %c1_51 = arith.constant 1 : index
      %c0_52 = arith.constant 0 : index
      %c0_53 = arith.constant 0 : index
      %84 = vector.load %arg9[%c1_51, %c0_52, %c0_53] : memref<8x8x4xf32, #tpu.memory_space<vmem>>, vector<1x8x4xf32>
      %85 = vector.shape_cast %84 : vector<1x8x4xf32> to vector<8x4xf32>
      %86 = vector.shape_cast %83 : vector<8x4xf32> to vector<1x8x4xf32>
      tpu.vector_store %arg9[%c1_51, %c0_52, %c0_53], %86 {strides = array<i32>} : memref<8x8x4xf32, #tpu.memory_space<vmem>>, vector<1x8x4xf32>,
      %87 = vector.extract_strided_slice %60 {offsets = [0, 8], sizes = [8, 4], strides = [1, 1]} : vector<8x32xf32> to vector<8x4xf32>
      %c2 = arith.constant 2 : index
      %c0_54 = arith.constant 0 : index
      %c0_55 = arith.constant 0 : index
      %88 = vector.load %arg7[%c2, %c0_54, %c0_55] : memref<8x8x4xf32, #tpu.memory_space<vmem>>, vector<1x8x4xf32>
      %89 = vector.shape_cast %88 : vector<1x8x4xf32> to vector<8x4xf32>
      %90 = vector.shape_cast %87 : vector<8x4xf32> to vector<1x8x4xf32>
      tpu.vector_store %arg7[%c2, %c0_54, %c0_55], %90 {strides = array<i32>} : memref<8x8x4xf32, #tpu.memory_space<vmem>>, vector<1x8x4xf32>,
      %91 = vector.extract_strided_slice %61 {offsets = [0, 8], sizes = [8, 4], strides = [1, 1]} : vector<8x32xf32> to vector<8x4xf32>
      %c2_56 = arith.constant 2 : index
      %c0_57 = arith.constant 0 : index
      %c0_58 = arith.constant 0 : index
      %92 = vector.load %arg8[%c2_56, %c0_57, %c0_58] : memref<8x8x4xf32, #tpu.memory_space<vmem>>, vector<1x8x4xf32>
      %93 = vector.shape_cast %92 : vector<1x8x4xf32> to vector<8x4xf32>
      %94 = vector.shape_cast %91 : vector<8x4xf32> to vector<1x8x4xf32>
      tpu.vector_store %arg8[%c2_56, %c0_57, %c0_58], %94 {strides = array<i32>} : memref<8x8x4xf32, #tpu.memory_space<vmem>>, vector<1x8x4xf32>,
      %95 = vector.extract_strided_slice %62 {offsets = [0, 8], sizes = [8, 4], strides = [1, 1]} : vector<8x32xf32> to vector<8x4xf32>
      %c2_59 = arith.constant 2 : index
      %c0_60 = arith.constant 0 : index
      %c0_61 = arith.constant 0 : index
      %96 = vector.load %arg9[%c2_59, %c0_60, %c0_61] : memref<8x8x4xf32, #tpu.memory_space<vmem>>, vector<1x8x4xf32>
      %97 = vector.shape_cast %96 : vector<1x8x4xf32> to vector<8x4xf32>
      %98 = vector.shape_cast %95 : vector<8x4xf32> to vector<1x8x4xf32>
      tpu.vector_store %arg9[%c2_59, %c0_60, %c0_61], %98 {strides = array<i32>} : memref<8x8x4xf32, #tpu.memory_space<vmem>>, vector<1x8x4xf32>,
      %99 = vector.extract_strided_slice %60 {offsets = [0, 12], sizes = [8, 4], strides = [1, 1]} : vector<8x32xf32> to vector<8x4xf32>
      %c3 = arith.constant 3 : index
      %c0_62 = arith.constant 0 : index
      %c0_63 = arith.constant 0 : index
      %100 = vector.load %arg7[%c3, %c0_62, %c0_63] : memref<8x8x4xf32, #tpu.memory_space<vmem>>, vector<1x8x4xf32>
      %101 = vector.shape_cast %100 : vector<1x8x4xf32> to vector<8x4xf32>
      %102 = vector.shape_cast %99 : vector<8x4xf32> to vector<1x8x4xf32>
      tpu.vector_store %arg7[%c3, %c0_62, %c0_63], %102 {strides = array<i32>} : memref<8x8x4xf32, #tpu.memory_space<vmem>>, vector<1x8x4xf32>,
      %103 = vector.extract_strided_slice %61 {offsets = [0, 12], sizes = [8, 4], strides = [1, 1]} : vector<8x32xf32> to vector<8x4xf32>
      %c3_64 = arith.constant 3 : index
      %c0_65 = arith.constant 0 : index
      %c0_66 = arith.constant 0 : index
      %104 = vector.load %arg8[%c3_64, %c0_65, %c0_66] : memref<8x8x4xf32, #tpu.memory_space<vmem>>, vector<1x8x4xf32>
      %105 = vector.shape_cast %104 : vector<1x8x4xf32> to vector<8x4xf32>
      %106 = vector.shape_cast %103 : vector<8x4xf32> to vector<1x8x4xf32>
      tpu.vector_store %arg8[%c3_64, %c0_65, %c0_66], %106 {strides = array<i32>} : memref<8x8x4xf32, #tpu.memory_space<vmem>>, vector<1x8x4xf32>,
      %107 = vector.extract_strided_slice %62 {offsets = [0, 12], sizes = [8, 4], strides = [1, 1]} : vector<8x32xf32> to vector<8x4xf32>
      %c3_67 = arith.constant 3 : index
      %c0_68 = arith.constant 0 : index
      %c0_69 = arith.constant 0 : index
      %108 = vector.load %arg9[%c3_67, %c0_68, %c0_69] : memref<8x8x4xf32, #tpu.memory_space<vmem>>, vector<1x8x4xf32>
      %109 = vector.shape_cast %108 : vector<1x8x4xf32> to vector<8x4xf32>
      %110 = vector.shape_cast %107 : vector<8x4xf32> to vector<1x8x4xf32>
      tpu.vector_store %arg9[%c3_67, %c0_68, %c0_69], %110 {strides = array<i32>} : memref<8x8x4xf32, #tpu.memory_space<vmem>>, vector<1x8x4xf32>,
      %111 = vector.extract_strided_slice %60 {offsets = [0, 16], sizes = [8, 4], strides = [1, 1]} : vector<8x32xf32> to vector<8x4xf32>
      %c4_70 = arith.constant 4 : index
      %c0_71 = arith.constant 0 : index
      %c0_72 = arith.constant 0 : index
      %112 = vector.load %arg7[%c4_70, %c0_71, %c0_72] : memref<8x8x4xf32, #tpu.memory_space<vmem>>, vector<1x8x4xf32>
      %113 = vector.shape_cast %112 : vector<1x8x4xf32> to vector<8x4xf32>
      %114 = vector.shape_cast %111 : vector<8x4xf32> to vector<1x8x4xf32>
      tpu.vector_store %arg7[%c4_70, %c0_71, %c0_72], %114 {strides = array<i32>} : memref<8x8x4xf32, #tpu.memory_space<vmem>>, vector<1x8x4xf32>,
      %115 = vector.extract_strided_slice %61 {offsets = [0, 16], sizes = [8, 4], strides = [1, 1]} : vector<8x32xf32> to vector<8x4xf32>
      %c4_73 = arith.constant 4 : index
      %c0_74 = arith.constant 0 : index
      %c0_75 = arith.constant 0 : index
      %116 = vector.load %arg8[%c4_73, %c0_74, %c0_75] : memref<8x8x4xf32, #tpu.memory_space<vmem>>, vector<1x8x4xf32>
      %117 = vector.shape_cast %116 : vector<1x8x4xf32> to vector<8x4xf32>
      %118 = vector.shape_cast %115 : vector<8x4xf32> to vector<1x8x4xf32>
      tpu.vector_store %arg8[%c4_73, %c0_74, %c0_75], %118 {strides = array<i32>} : memref<8x8x4xf32, #tpu.memory_space<vmem>>, vector<1x8x4xf32>,
      %119 = vector.extract_strided_slice %62 {offsets = [0, 16], sizes = [8, 4], strides = [1, 1]} : vector<8x32xf32> to vector<8x4xf32>
      %c4_76 = arith.constant 4 : index
      %c0_77 = arith.constant 0 : index
      %c0_78 = arith.constant 0 : index
      %120 = vector.load %arg9[%c4_76, %c0_77, %c0_78] : memref<8x8x4xf32, #tpu.memory_space<vmem>>, vector<1x8x4xf32>
      %121 = vector.shape_cast %120 : vector<1x8x4xf32> to vector<8x4xf32>
      %122 = vector.shape_cast %119 : vector<8x4xf32> to vector<1x8x4xf32>
      tpu.vector_store %arg9[%c4_76, %c0_77, %c0_78], %122 {strides = array<i32>} : memref<8x8x4xf32, #tpu.memory_space<vmem>>, vector<1x8x4xf32>,
      %123 = vector.extract_strided_slice %60 {offsets = [0, 20], sizes = [8, 4], strides = [1, 1]} : vector<8x32xf32> to vector<8x4xf32>
      %c5 = arith.constant 5 : index
      %c0_79 = arith.constant 0 : index
      %c0_80 = arith.constant 0 : index
      %124 = vector.load %arg7[%c5, %c0_79, %c0_80] : memref<8x8x4xf32, #tpu.memory_space<vmem>>, vector<1x8x4xf32>
      %125 = vector.shape_cast %124 : vector<1x8x4xf32> to vector<8x4xf32>
      %126 = vector.shape_cast %123 : vector<8x4xf32> to vector<1x8x4xf32>
      tpu.vector_store %arg7[%c5, %c0_79, %c0_80], %126 {strides = array<i32>} : memref<8x8x4xf32, #tpu.memory_space<vmem>>, vector<1x8x4xf32>,
      %127 = vector.extract_strided_slice %61 {offsets = [0, 20], sizes = [8, 4], strides = [1, 1]} : vector<8x32xf32> to vector<8x4xf32>
      %c5_81 = arith.constant 5 : index
      %c0_82 = arith.constant 0 : index
      %c0_83 = arith.constant 0 : index
      %128 = vector.load %arg8[%c5_81, %c0_82, %c0_83] : memref<8x8x4xf32, #tpu.memory_space<vmem>>, vector<1x8x4xf32>
      %129 = vector.shape_cast %128 : vector<1x8x4xf32> to vector<8x4xf32>
      %130 = vector.shape_cast %127 : vector<8x4xf32> to vector<1x8x4xf32>
      tpu.vector_store %arg8[%c5_81, %c0_82, %c0_83], %130 {strides = array<i32>} : memref<8x8x4xf32, #tpu.memory_space<vmem>>, vector<1x8x4xf32>,
      %131 = vector.extract_strided_slice %62 {offsets = [0, 20], sizes = [8, 4], strides = [1, 1]} : vector<8x32xf32> to vector<8x4xf32>
      %c5_84 = arith.constant 5 : index
      %c0_85 = arith.constant 0 : index
      %c0_86 = arith.constant 0 : index
      %132 = vector.load %arg9[%c5_84, %c0_85, %c0_86] : memref<8x8x4xf32, #tpu.memory_space<vmem>>, vector<1x8x4xf32>
      %133 = vector.shape_cast %132 : vector<1x8x4xf32> to vector<8x4xf32>
      %134 = vector.shape_cast %131 : vector<8x4xf32> to vector<1x8x4xf32>
      tpu.vector_store %arg9[%c5_84, %c0_85, %c0_86], %134 {strides = array<i32>} : memref<8x8x4xf32, #tpu.memory_space<vmem>>, vector<1x8x4xf32>,
      %135 = vector.extract_strided_slice %60 {offsets = [0, 24], sizes = [8, 4], strides = [1, 1]} : vector<8x32xf32> to vector<8x4xf32>
      %c6 = arith.constant 6 : index
      %c0_87 = arith.constant 0 : index
      %c0_88 = arith.constant 0 : index
      %136 = vector.load %arg7[%c6, %c0_87, %c0_88] : memref<8x8x4xf32, #tpu.memory_space<vmem>>, vector<1x8x4xf32>
      %137 = vector.shape_cast %136 : vector<1x8x4xf32> to vector<8x4xf32>
      %138 = vector.shape_cast %135 : vector<8x4xf32> to vector<1x8x4xf32>
      tpu.vector_store %arg7[%c6, %c0_87, %c0_88], %138 {strides = array<i32>} : memref<8x8x4xf32, #tpu.memory_space<vmem>>, vector<1x8x4xf32>,
      %139 = vector.extract_strided_slice %61 {offsets = [0, 24], sizes = [8, 4], strides = [1, 1]} : vector<8x32xf32> to vector<8x4xf32>
      %c6_89 = arith.constant 6 : index
      %c0_90 = arith.constant 0 : index
      %c0_91 = arith.constant 0 : index
      %140 = vector.load %arg8[%c6_89, %c0_90, %c0_91] : memref<8x8x4xf32, #tpu.memory_space<vmem>>, vector<1x8x4xf32>
      %141 = vector.shape_cast %140 : vector<1x8x4xf32> to vector<8x4xf32>
      %142 = vector.shape_cast %139 : vector<8x4xf32> to vector<1x8x4xf32>
      tpu.vector_store %arg8[%c6_89, %c0_90, %c0_91], %142 {strides = array<i32>} : memref<8x8x4xf32, #tpu.memory_space<vmem>>, vector<1x8x4xf32>,
      %143 = vector.extract_strided_slice %62 {offsets = [0, 24], sizes = [8, 4], strides = [1, 1]} : vector<8x32xf32> to vector<8x4xf32>
      %c6_92 = arith.constant 6 : index
      %c0_93 = arith.constant 0 : index
      %c0_94 = arith.constant 0 : index
      %144 = vector.load %arg9[%c6_92, %c0_93, %c0_94] : memref<8x8x4xf32, #tpu.memory_space<vmem>>, vector<1x8x4xf32>
      %145 = vector.shape_cast %144 : vector<1x8x4xf32> to vector<8x4xf32>
      %146 = vector.shape_cast %143 : vector<8x4xf32> to vector<1x8x4xf32>
      tpu.vector_store %arg9[%c6_92, %c0_93, %c0_94], %146 {strides = array<i32>} : memref<8x8x4xf32, #tpu.memory_space<vmem>>, vector<1x8x4xf32>,
      %147 = vector.extract_strided_slice %60 {offsets = [0, 28], sizes = [8, 4], strides = [1, 1]} : vector<8x32xf32> to vector<8x4xf32>
      %c7 = arith.constant 7 : index
      %c0_95 = arith.constant 0 : index
      %c0_96 = arith.constant 0 : index
      %148 = vector.load %arg7[%c7, %c0_95, %c0_96] : memref<8x8x4xf32, #tpu.memory_space<vmem>>, vector<1x8x4xf32>
      %149 = vector.shape_cast %148 : vector<1x8x4xf32> to vector<8x4xf32>
      %150 = vector.shape_cast %147 : vector<8x4xf32> to vector<1x8x4xf32>
      tpu.vector_store %arg7[%c7, %c0_95, %c0_96], %150 {strides = array<i32>} : memref<8x8x4xf32, #tpu.memory_space<vmem>>, vector<1x8x4xf32>,
      %151 = vector.extract_strided_slice %61 {offsets = [0, 28], sizes = [8, 4], strides = [1, 1]} : vector<8x32xf32> to vector<8x4xf32>
      %c7_97 = arith.constant 7 : index
      %c0_98 = arith.constant 0 : index
      %c0_99 = arith.constant 0 : index
      %152 = vector.load %arg8[%c7_97, %c0_98, %c0_99] : memref<8x8x4xf32, #tpu.memory_space<vmem>>, vector<1x8x4xf32>
      %153 = vector.shape_cast %152 : vector<1x8x4xf32> to vector<8x4xf32>
      %154 = vector.shape_cast %151 : vector<8x4xf32> to vector<1x8x4xf32>
      tpu.vector_store %arg8[%c7_97, %c0_98, %c0_99], %154 {strides = array<i32>} : memref<8x8x4xf32, #tpu.memory_space<vmem>>, vector<1x8x4xf32>,
      %155 = vector.extract_strided_slice %62 {offsets = [0, 28], sizes = [8, 4], strides = [1, 1]} : vector<8x32xf32> to vector<8x4xf32>
      %c7_100 = arith.constant 7 : index
      %c0_101 = arith.constant 0 : index
      %c0_102 = arith.constant 0 : index
      %156 = vector.load %arg9[%c7_100, %c0_101, %c0_102] : memref<8x8x4xf32, #tpu.memory_space<vmem>>, vector<1x8x4xf32>
      %157 = vector.shape_cast %156 : vector<1x8x4xf32> to vector<8x4xf32>
      %158 = vector.shape_cast %155 : vector<8x4xf32> to vector<1x8x4xf32>
      tpu.vector_store %arg9[%c7_100, %c0_101, %c0_102], %158 {strides = array<i32>} : memref<8x8x4xf32, #tpu.memory_space<vmem>>, vector<1x8x4xf32>,
    } else {
    }
    %c8_i32 = arith.constant 8 : i32
    %3 = arith.muli %arg1, %c8_i32 : i32
    %4 = tpu.assume_multiple %3, 8 : i32
    %c0 = arith.constant 0 : index
    %5 = arith.index_cast %4 : i32 to index
    %c0_1 = arith.constant 0 : index
    %6 = vector.load %arg7[%c0, %5, %c0_1] : memref<8x8x4xf32, #tpu.memory_space<vmem>>, vector<8x8x4xf32>
    %c0_2 = arith.constant 0 : index
    %c0_3 = arith.constant 0 : index
    %c0_4 = arith.constant 0 : index
    %7 = vector.load %arg8[%c0_2, %c0_3, %c0_4] : memref<8x8x4xf32, #tpu.memory_space<vmem>>, vector<8x8x4xf32>
    %c0_5 = arith.constant 0 : index
    %c0_6 = arith.constant 0 : index
    %c0_7 = arith.constant 0 : index
    %8 = vector.load %arg9[%c0_5, %c0_6, %c0_7] : memref<8x8x4xf32, #tpu.memory_space<vmem>>, vector<8x8x4xf32>
    "tpu.trace_start"() <{level = 10 : i32, message = "hqd,hkd->hqk"}> : () -> ()
    %cst = arith.constant dense<0.000000e+00> : vector<8x8x8xf32>
    %9 = tpu.matmul %6, %7, %cst {dimension_numbers = #tpu.dot_dimension_numbers<[2], [2], [1], [1], [0, 0, 0, 1, 1, 1], [0], [0]>} : vector<8x8x4xf32>, vector<8x8x4xf32>, vector<8x8x8xf32> -> vector<8x8x8xf32>
    "tpu.trace_stop"() : () -> ()
    %cst_8 = arith.constant dense<0xFF800000> : vector<8x8xf32>
    %10 = vector.multi_reduction <maximumf>, %9, %cst_8 [2] : vector<8x8x8xf32> to vector<8x8xf32>
    %11 = vector.shape_cast %10 : vector<8x8xf32> to vector<8x8x1xf32>
    %12 = vector.broadcast %11 : vector<8x8x1xf32> to vector<8x8x8xf32>
    %13 = arith.subf %9, %12 : vector<8x8x8xf32>
    %14 = math.exp %13 : vector<8x8x8xf32>
    %cst_9 = arith.constant dense<0.000000e+00> : vector<8x8xf32>
    %15 = vector.multi_reduction <add>, %14, %cst_9 [2] : vector<8x8x8xf32> to vector<8x8xf32>
    %16 = vector.shape_cast %15 : vector<8x8xf32> to vector<8x8x1xf32>
    "tpu.trace_start"() <{level = 10 : i32, message = "hqk,hkd->hqd"}> : () -> ()
    %cst_10 = arith.constant dense<0.000000e+00> : vector<8x8x4xf32>
    %17 = tpu.matmul %14, %8, %cst_10 {dimension_numbers = #tpu.dot_dimension_numbers<[2], [1], [1], [2], [0, 0, 0, 1, 1, 2], [0], [0]>} : vector<8x8x8xf32>, vector<8x8x4xf32>, vector<8x8x4xf32> -> vector<8x8x4xf32>
    "tpu.trace_stop"() : () -> ()
    %18 = tpu.reciprocal %16 {approx = true} : vector<8x8x1xf32> -> vector<8x8x1xf32>
    %19 = vector.broadcast %18 : vector<8x8x1xf32> to vector<8x8x4xf32>
    %20 = arith.mulf %17, %19 : vector<8x8x4xf32>
    %21 = vector.extract_strided_slice %20 {offsets = [0, 0, 0], sizes = [1, 8, 4], strides = [1, 1, 1]} : vector<8x8x4xf32> to vector<1x8x4xf32>
    %22 = vector.shape_cast %21 : vector<1x8x4xf32> to vector<8x4xf32>
    %c0_11 = arith.constant 0 : index
    %c0_12 = arith.constant 0 : index
    %23 = vector.load %arg10[%c0_11, %c0_12] : memref<8x32xf32, #tpu.memory_space<vmem>>, vector<8x4xf32>
    tpu.vector_store %arg10[%c0_11, %c0_12], %22 {strides = array<i32>} : memref<8x32xf32, #tpu.memory_space<vmem>>, vector<8x4xf32>,
    %24 = vector.extract_strided_slice %20 {offsets = [1, 0, 0], sizes = [1, 8, 4], strides = [1, 1, 1]} : vector<8x8x4xf32> to vector<1x8x4xf32>
    %25 = vector.shape_cast %24 : vector<1x8x4xf32> to vector<8x4xf32>
    %c0_13 = arith.constant 0 : index
    %c4 = arith.constant 4 : index
    %26 = vector.load %arg10[%c0_13, %c4] : memref<8x32xf32, #tpu.memory_space<vmem>>, vector<8x4xf32>
    tpu.vector_store %arg10[%c0_13, %c4], %25 {strides = array<i32>} : memref<8x32xf32, #tpu.memory_space<vmem>>, vector<8x4xf32>,
    %27 = vector.extract_strided_slice %20 {offsets = [2, 0, 0], sizes = [1, 8, 4], strides = [1, 1, 1]} : vector<8x8x4xf32> to vector<1x8x4xf32>
    %28 = vector.shape_cast %27 : vector<1x8x4xf32> to vector<8x4xf32>
    %c0_14 = arith.constant 0 : index
    %c8 = arith.constant 8 : index
    %29 = vector.load %arg10[%c0_14, %c8] : memref<8x32xf32, #tpu.memory_space<vmem>>, vector<8x4xf32>
    tpu.vector_store %arg10[%c0_14, %c8], %28 {strides = array<i32>} : memref<8x32xf32, #tpu.memory_space<vmem>>, vector<8x4xf32>,
    %30 = vector.extract_strided_slice %20 {offsets = [3, 0, 0], sizes = [1, 8, 4], strides = [1, 1, 1]} : vector<8x8x4xf32> to vector<1x8x4xf32>
    %31 = vector.shape_cast %30 : vector<1x8x4xf32> to vector<8x4xf32>
    %c0_15 = arith.constant 0 : index
    %c12 = arith.constant 12 : index
    %32 = vector.load %arg10[%c0_15, %c12] : memref<8x32xf32, #tpu.memory_space<vmem>>, vector<8x4xf32>
    tpu.vector_store %arg10[%c0_15, %c12], %31 {strides = array<i32>} : memref<8x32xf32, #tpu.memory_space<vmem>>, vector<8x4xf32>,
    %33 = vector.extract_strided_slice %20 {offsets = [4, 0, 0], sizes = [1, 8, 4], strides = [1, 1, 1]} : vector<8x8x4xf32> to vector<1x8x4xf32>
    %34 = vector.shape_cast %33 : vector<1x8x4xf32> to vector<8x4xf32>
    %c0_16 = arith.constant 0 : index
    %c16 = arith.constant 16 : index
    %35 = vector.load %arg10[%c0_16, %c16] : memref<8x32xf32, #tpu.memory_space<vmem>>, vector<8x4xf32>
    tpu.vector_store %arg10[%c0_16, %c16], %34 {strides = array<i32>} : memref<8x32xf32, #tpu.memory_space<vmem>>, vector<8x4xf32>,
    %36 = vector.extract_strided_slice %20 {offsets = [5, 0, 0], sizes = [1, 8, 4], strides = [1, 1, 1]} : vector<8x8x4xf32> to vector<1x8x4xf32>
    %37 = vector.shape_cast %36 : vector<1x8x4xf32> to vector<8x4xf32>
    %c0_17 = arith.constant 0 : index
    %c20 = arith.constant 20 : index
    %38 = vector.load %arg10[%c0_17, %c20] : memref<8x32xf32, #tpu.memory_space<vmem>>, vector<8x4xf32>
    tpu.vector_store %arg10[%c0_17, %c20], %37 {strides = array<i32>} : memref<8x32xf32, #tpu.memory_space<vmem>>, vector<8x4xf32>,
    %39 = vector.extract_strided_slice %20 {offsets = [6, 0, 0], sizes = [1, 8, 4], strides = [1, 1, 1]} : vector<8x8x4xf32> to vector<1x8x4xf32>
    %40 = vector.shape_cast %39 : vector<1x8x4xf32> to vector<8x4xf32>
    %c0_18 = arith.constant 0 : index
    %c24 = arith.constant 24 : index
    %41 = vector.load %arg10[%c0_18, %c24] : memref<8x32xf32, #tpu.memory_space<vmem>>, vector<8x4xf32>
    tpu.vector_store %arg10[%c0_18, %c24], %40 {strides = array<i32>} : memref<8x32xf32, #tpu.memory_space<vmem>>, vector<8x4xf32>,
    %42 = vector.extract_strided_slice %20 {offsets = [7, 0, 0], sizes = [1, 8, 4], strides = [1, 1, 1]} : vector<8x8x4xf32> to vector<1x8x4xf32>
    %43 = vector.shape_cast %42 : vector<1x8x4xf32> to vector<8x4xf32>
    %c0_19 = arith.constant 0 : index
    %c28 = arith.constant 28 : index
    %44 = vector.load %arg10[%c0_19, %c28] : memref<8x32xf32, #tpu.memory_space<vmem>>, vector<8x4xf32>
    tpu.vector_store %arg10[%c0_19, %c28], %43 {strides = array<i32>} : memref<8x32xf32, #tpu.memory_space<vmem>>, vector<8x4xf32>,
    %c0_20 = arith.constant 0 : index
    %c0_21 = arith.constant 0 : index
    %45 = vector.load %arg10[%c0_20, %c0_21] : memref<8x32xf32, #tpu.memory_space<vmem>>, vector<8x32xf32>
    %c0_22 = arith.constant 0 : index
    %c0_23 = arith.constant 0 : index
    %46 = vector.load %arg4[%c0_22, %c0_23] : memref<32x32xf32, #tpu.memory_space<vmem>>, vector<32x32xf32>
    %cst_24 = arith.constant dense<0.000000e+00> : vector<8x32xf32>
    %47 = tpu.matmul %45, %46, %cst_24 {dimension_numbers = #tpu.dot_dimension_numbers<[1], [0], [0], [1], [0, 0, 1, 1], [], []>} : vector<8x32xf32>, vector<32x32xf32>, vector<8x32xf32> -> vector<8x32xf32>
    %c0_25 = arith.constant 0 : index
    %c0_26 = arith.constant 0 : index
    %48 = vector.load %arg5[%c0_25, %c0_26] : memref<1x32xf32, #tpu.memory_space<vmem>>, vector<1x32xf32>
    %49 = vector.broadcast %48 : vector<1x32xf32> to vector<8x32xf32>
    %50 = arith.addf %47, %49 : vector<8x32xf32>
    %c0_27 = arith.constant 0 : index
    %c0_28 = arith.constant 0 : index
    %c0_29 = arith.constant 0 : index
    %51 = vector.load %arg6[%c0_27, %c0_28, %c0_29] : memref<1x8x32xf32, #tpu.memory_space<vmem>>, vector<1x8x32xf32>
    %52 = vector.shape_cast %51 : vector<1x8x32xf32> to vector<8x32xf32>
    %53 = vector.shape_cast %50 : vector<8x32xf32> to vector<1x8x32xf32>
    tpu.vector_store %arg6[%c0_27, %c0_28, %c0_29], %53 {strides = array<i32>} : memref<1x8x32xf32, #tpu.memory_space<vmem>>, vector<1x8x32xf32>,
    return
  }
  func.func @transform_0(%arg0: i32, %arg1: i32) -> (i32, i32, i32) {
    %c0_i32 = arith.constant 0 : i32
    %c0_i32_0 = arith.constant 0 : i32
    %c0_i32_1 = arith.constant 0 : i32
    return %arg0, %c0_i32, %c0_i32_0 : i32, i32, i32
  }
  func.func @transform_1(%arg0: i32, %arg1: i32) -> (i32, i32) {
    %c0_i32 = arith.constant 0 : i32
    %c0_i32_0 = arith.constant 0 : i32
    %c0_i32_1 = arith.constant 0 : i32
    return %c0_i32, %c0_i32_0 : i32, i32
  }
  func.func @transform_2(%arg0: i32, %arg1: i32) -> (i32, i32) {
    %c0_i32 = arith.constant 0 : i32
    %c0_i32_0 = arith.constant 0 : i32
    %c0_i32_1 = arith.constant 0 : i32
    return %c0_i32, %c0_i32_0 : i32, i32
  }
  func.func @transform_3(%arg0: i32, %arg1: i32) -> (i32, i32) {
    %c0_i32 = arith.constant 0 : i32
    %c0_i32_0 = arith.constant 0 : i32
    %c0_i32_1 = arith.constant 0 : i32
    return %c0_i32, %c0_i32_0 : i32, i32
  }
  func.func @transform_4(%arg0: i32, %arg1: i32) -> (i32, i32, i32) {
    %c0_i32 = arith.constant 0 : i32
    %c0_i32_0 = arith.constant 0 : i32
    return %arg0, %arg1, %c0_i32 : i32, i32, i32
  }
}

</mosaic_0001>

<bundles_post_ra>
// kernel: tpu_custom_call.1
= control target key start
LH: loop header
LB: loop body
LE: loop exit
PB: predicated region body
PF: predicated region fallthrough
CT: control target
= control target key end

     0   :  { %9 = vsyncpa [#allocation7], 0  ;;  %s2918_s0 = inlined_call_operand.hbm [shape: f32[2,8,32], index: 0, kind: input, shape index: {}]   ;;  %s2919_s1 = inlined_call_operand.hbm [shape: f32[32,96], index: 1, kind: input, shape index: {}]   ;;  %s2920_s2 = inlined_call_operand.hbm [shape: f32[32,32], index: 2, kind: input, shape index: {}]   ;;  %s2921_s3 = inlined_call_operand.vmem [shape: f32[1,32], index: 3, kind: input, shape index: {}]   ;;  %s2922_s4 = inlined_call_operand.hbm [shape: f32[2,8,32], index: 4, kind: output, shape index: {}]  }
   0x1   :  { %11 = vsyncpa [#allocation7 + $0x1], 0 }
   0x2   :  { %12 = vsyncpa [#allocation10], 0 }
   0x3   :  { %13 = vsyncpa [#allocation8], 0 }
   0x4   :  { %15 = vsyncpa [#allocation8 + $0x1], 0  ;;  %s2576_s15 = smov 0   ;;  %s2578_s16 = smov 0  }
   0x5   :  { %s2580_s17 = smov 0   ;;  %s2582_s18 = smov 0  }
   0x6   :  { %s2584_s19 = smov 0   ;;  %s2586_s20 = smov 0  }
   0x7 LB: > { %s2010_s21 = sadd.s32 4294967295, %s2511_s20   ;;  %s2011_s22 = sadd.s32 4294967294, %s2511_s20   ;;  %s2511_s20 = sphi %s2586_s20, %s21_s20   ;;  %s2507_s19 = sphi %s2584_s19, %s2942_s19   ;;  %s2503_s18 = sphi %s2582_s18, %s2941_s18   ;;  %s2499_s17 = sphi %s2580_s17, %s2940_s17   ;;  %s2495_s16 = sphi %s2578_s16, %s2939_s16   ;;  %s2491_s15 = sphi %s2576_s15, %s2938_s15  }
   0x8   : > { %p53_p0 = scmp.ne.s32.totalorder %s2495_s16, %s2491_s15  ;;  %p2610_p1 = scmp.eq.s32.totalorder %s2010_s21, 0 }
   0x9   : > { %p2614_p2 = scmp.eq.s32.totalorder %s2010_s21, 1  ;;  %p148_p3 = scmp.eq.s32.totalorder %s2011_s22, 1 }
   0xa   : > { %s2926_s23 = scalar_select %p2610_p1, 1, 0 }
   0xb   : > { %p2620_p4 = por %p2610_p1, %p53_p0  ;;  %p2012_p5 = scmp.ge.s32.totalorder %s2511_s20, 1 }
   0xc   : > { %p2625_p6 = por %p148_p3, %p53_p0  ;;  %p155_p7 = scmp.lt.s32.totalorder %s2511_s20, 3 }
   0xd   : > { %s2928_s25 = scalar_select %p2620_p4, 1, 0 }
   0xe   : > { %s2929_s26 = scalar_select %p2625_p6, 1, 0 }
   0xf   : > { %p2630_p8 = pnand %p2012_p5, %p155_p7  ;;  %s2513_s28 = smov [#allocation9]  }
  0x10   : > { %s167_s29 = sshll.u32 %s2513_s28, 4  ;;  %s2514_s5 = smov [#allocation11]   ;;  %s168_s29 = int_to_ptr.vmem [resolvable:$true] %s167_s29 }
  0x11   : > { %p2210_p9 = pneg %p2630_p8  ;;  %s180_s6 = sshll.u32 %s2514_s5, 4  ;;  %s181_s6 = int_to_ptr.vmem [resolvable:$true] %s180_s6 }
  0x12   : > { %s2358_s7 = scalar_lea.vmem %s168_s29, 512  ;;  %p2366_p5 = scmp.lt.s32.totalorder %s168_s29, %s168_s29 }
  0x13   : > { %p2639_p11 = pnand %p2210_p9, %p2610_p1  ;;  %p2359_p13 = scmp.ne.s32.totalorder %s168_s29, %s2358_s7 }
  0x14   : > { %p2367_p7 = scmp.lt.s32.totalorder %s2358_s7, %s2358_s7 }
  0x15   : > { %p2349_p12 = pneg %p2639_p11 }
  0x16   : > { %p2368_p10 = por %p2367_p7, %p2366_p5 }
  0x17   : > { %p2361_p0 = pnand %p2359_p13, %p2349_p12 }
  0x19   : > { %p2362_p3 = pneg %p2361_p0 }
  0x1b   : > { %p2369_p9 = pnand %p2368_p10, %p2362_p3 }
  0x1d   : > { %2372 = shalt.err (!%p2369_p9)
}
  0x1e   : > { %s2515_s8 = smov 128   ;;  %s2516_s9 = smov 8  }
  0x1f   : > { %2213 = dma.hbm_to_vmem [thread:$0]  (!%p2639_p11), %s2919_s1, 512, %s168_s29, [#allocation10], %s2515_s8, %s2515_s8, %s2516_s9  }
  0x20   : > { %s2384_s12 = scalar_lea.vmem %s181_s6, 512  ;;  %p2392_p1 = scmp.lt.s32.totalorder %s181_s6, %s181_s6 }
  0x21   : > { %p2385_p6 = scmp.ne.s32.totalorder %s181_s6, %s2384_s12  ;;  %p2393_p4 = scmp.lt.s32.totalorder %s2384_s12, %s2384_s12 }
  0x23   : > { %p2387_p13 = pnand %p2385_p6, %p2349_p12  ;;  %p2394_p5 = por %p2393_p4, %p2392_p1 }
  0x25   : > { %p2388_p0 = pneg %p2387_p13 }
  0x27   : > { %p2395_p10 = pnand %p2394_p5, %p2388_p0 }
  0x29   : > { %2398 = shalt.err (!%p2395_p10)
}
  0x2a   : > { %2216 = dma.hbm_to_vmem [thread:$0]  (!%p2639_p11), %s2920_s2, 512, %s181_s6, [#allocation10], %s2515_s8, %s2515_s8, %s2516_s9  }
  0x2b   : > { %s33_s21 = sadd.s32 1, %s2507_s19  ;;  %s40_s22 = sadd.s32 1, %s2499_s17 }
  0x2c   : > { %p35_p1 = scmp.ge.s32.totalorder %s33_s21, 2  ;;  %p47_p4 = scmp.ne.s32.totalorder %s2499_s17, %s2495_s16 }
  0x2d   : > { %p48_p6 = scmp.eq.s32.totalorder %s2511_s20, 0  ;;  %p2227_p12 = scmp.lt.s32.totalorder %s2511_s20, 2 }
  0x2e   : > { %s2944_s21 = smov (%p35_p1, %s33_s21), 0  ;;  %p2671_p7 = por %p2614_p2, %p47_p4 }
  0x2f   : > { %p49_p3 = por %p48_p6, %p47_p4  ;;  %s37_s29 = ssub.s32 %s2507_s19, %s2944_s21 }
  0x30   : > { %s197_s30 = sand.u32 1, %s2499_s17   ;;  %p38_p9 = scmp.eq.s32.totalorder %s37_s29, 0 }
  0x31   : > { %s2016_s5 = sshll.u32 %s197_s30, 3  ;;  %s2017_s6 = sshll.u32 %s2507_s19, 7 }
  0x32   : > { %s2680_s7 = scalar_select %p38_p9, %s2499_s17, %s40_s22  }
  0x33   : > { %s206_s10 = scalar_lea.hbm %s2918_s0, %s2017_s6  ;;  %s201_s11 = scalar_lea.vmem [#allocation6], %s2016_s5 }
  0x34   : > { %s208_s12 = sshll.u32 %s201_s11, 4  ;;  %p2687_p11 = pnand %p2227_p12, %p49_p3  ;;  %s209_s12 = int_to_ptr.vmem [resolvable:$true] %s208_s12 }
  0x35   : > { %s198_s13 = scalar_lea.sflag [#allocation7], %s197_s30  ;;  %s2412_s14 = scalar_lea.vmem %s209_s12, 128 }
  0x36   : > { %p2401_p2 = pneg %p2687_p11  ;;  %p2413_p13 = scmp.ne.s32.totalorder %s209_s12, %s2412_s14 }
  0x37   : > { %s2517_s22 = smov [#allocation6]  }
  0x38   : > { %p2415_p0 = pnand %p2413_p13, %p2401_p2  ;;  %s2417_s29 = sshll.u32 %s2517_s22, 4  ;;  %s2418_s29 = int_to_ptr.vmem [resolvable:$false] %s2417_s29 }
  0x39   : > { %s2419_s6 = scalar_lea.vmem %s2418_s29, 256  ;;  %p2420_p10 = scmp.lt.s32.totalorder %s209_s12, %s2418_s29 }
  0x3a   : > { %p2416_p5 = pneg %p2415_p0  ;;  %p2421_p1 = scmp.lt.s32.totalorder %s2419_s6, %s2412_s14 }
  0x3c   : > { %p2422_p4 = por %p2421_p1, %p2420_p10 }
  0x3e   : > { %p2423_p6 = pnand %p2422_p4, %p2416_p5 }
  0x40   : > { %2426 = shalt.err (!%p2423_p6)
}
  0x41   : > { %2220 = dma.hbm_to_vmem [thread:$0]  (!%p2687_p11), %s206_s10, 128, %s209_s12, %s198_s13  }
  0x42   : > { %217 = sbr.rel (%p2630_p8) target bundleno = 1321 (0x529), region = 36  ;;  %s2698_s30 = sand.u32 (!%p2630_p8), 1, %s2495_s16  }
  0x43   : > { %s2019_s5 = sshll.u32 (!%p2630_p8), %s2698_s30, 3  ;;  %s220_s8 = scalar_lea.sflag (!%p2630_p8), [#allocation7], %s2698_s30 }
  0x44   : > { %s223_s9 = scalar_lea.vmem (!%p2630_p8), [#allocation6], %s2019_s5  ;;  %p2934_p12 = scmp.ne.s32.totalorder (!%p2630_p8), %s2928_s25, 0 }
  0x47   : > { %2478 = dma.done.wait (%p2934_p12), %s220_s8, 128  }
  0x48   : > { %2480 = vsyncadd (%p2934_p12), %s220_s8, 4294967168  ;;  %p2935_p3 = scmp.ne.s32.totalorder %s2926_s23, 0 }
  0x4a   : > { %2482 = dma.done.wait (%p2935_p3), [#allocation10], 1024  }
  0x4b   : > { %2484 = vsyncadd (%p2935_p3), [#allocation10], 4294966272  ;;  %v2518_v0 = vmov 0.0   ;;  %vm2519_vm0 = vmmov 0   ;;  %v264_v1 = vld [vmem:[#allocation9 + $0x18] sm:$0xff]  ;;  %v263_v2 = vld [vmem:[#allocation9 + $0x10] sm:$0xff] }
  0x4c   : > { %2096 = vmatprep.subr.mxu0 %v2518_v0  ;;  %2104 = vmatprep.mubr.msk.f32.mxu0 %vm2519_vm0, %v2518_v0  ;;  %v262_v3 = vld [vmem:[#allocation9 + $0x8] sm:$0xff]  ;;  %v261_v4 = vld [vmem:[#allocation9] sm:$0xff]  ;;  %v260_v5 = vld [vmem:[%s223_s9] sm:$0xff]  ;;  %vm265_vm1 = vcmask 261120   ;;  %vm340_vm2 = vcmask 31744   ;;  %s2520_s23 = smov 88  }
  0x4d   : > { %2107 = vmatprep.subr.mxu1 %v2518_v0  ;;  %2109 = vmatprep.mubr.msk.f32.mxu1 %vm2519_vm0, %v2518_v0  ;;  %s2521_s25 = smov 96   ;;  %s2522_s27 = smov 84   ;;  %vm1092_vm3 = vcmask 64512   ;;  %vm1770_vm4 = vcmask 64544   ;;  %vm1776_vm5 = vcmask 97344   ;;  %vm1782_vm6 = vcmask 130144  }
  0x4e   : > { %2097 = vmatpush3.msra.mxu0 %v264_v1  ;;  %s2523_s10 = smov 92   ;;  %s2524_s11 = smov 76   ;;  %vm1788_vm7 = vcmask 162944   ;;  %vm1794_vm8 = vcmask 195744   ;;  %vm1800_vm9 = vcmask 228544   ;;  %vm1806_vm10 = vcmask 261344  }
  0x4f   : > { %2098 = vmatprep.subr.mxu0 %v2518_v0  ;;  %s2525_s12 = smov 124   ;;  %s2526_s24 = smov 68  }
  0x50   : > { %2099 = vmatpush3.msra.mxu0 %v263_v2  ;;  %s2527_s13 = smov 80   ;;  %s2528_s14 = smov 120  }
  0x51   : > { %2100 = vmatprep.subr.mxu0 %v2518_v0  ;;  %s2529_s22 = smov 72   ;;  %s2530_s29 = smov 116  }
  0x52   : > { %2101 = vmatpush3.msra.mxu0 %v262_v3  ;;  %s2531_s6 = smov 112   ;;  %s2532_s8 = smov 108  }
  0x53   : > { %2102 = vmatprep.subr.mxu0 %v2518_v0  ;;  %s2533_s9 = smov 104  }
  0x54   : > { %2103 = vmatpush3.msra.mxu0 %v261_v4 }
  0x55   : > { %2105 = vmatmul.mubr.msk.f32.vlgmr.msra.gmra.mxu0 %vm265_vm1, %v260_v5  ;;  %2127 = vmatprep.subr.mxu0 %v2518_v0 }
  0x56   : > { %2129 = vmatprep.mubr.msk.f32.mxu0 %vm2519_vm0, %v2518_v0 }
 0x115   : > { %v2725_v6 = vpop.f32.mrf.mxu0 }
 0x116   : > { %372 = vrot.lane.b32.xlu1 %v2725_v6, %s2520_s23  ;;  %343 = vrot.lane.b32.xlu0 %v2725_v6, %s2521_s25  ;;  %v339_v7 = vmul.f32 0.5, %v2725_v6  ;;  %s2534_s23 = smov 100   ;;  %s2535_s25 = smov 60  }
 0x117   : > { %v2106_v8 = vpop.f32.mrf.mxu0 }
 0x118   : > { %341 = vst.msk [vmem:[#allocation2] sm:$0xff] %vm340_vm2, %v339_v7 }
 0x11a   : > { %387 = vrot.lane.b32.xlu1 %v2725_v6, %s2522_s27  ;;  %357 = vrot.lane.b32.xlu0 %v2725_v6, %s2523_s10  ;;  %s2536_s27 = smov 64   ;;  %s2537_s10 = smov 56  }
 0x11e   : > { %417 = vrot.lane.b32.xlu0 %v2725_v6, %s2524_s11  ;;  %352 = vrot.lane.b32.xlu1 %v339_v7, %s2525_s12  ;;  %s2538_s11 = smov 52   ;;  %s2539_s12 = smov 48  }
 0x11f   : > { %v459_v16 = vld [vmem:[#allocation2] sm:$0xff] }
 0x122   : > { %447 = vrot.lane.b32.xlu0 %v2725_v6, %s2526_s24  ;;  %402 = vrot.lane.b32.xlu1 %v2725_v6, %s2527_s13  ;;  %s2540_s24 = smov 44   ;;  %s2541_s13 = smov 40  }
 0x126   : > { %367 = vrot.lane.b32.xlu0 %v339_v7, %s2528_s14  ;;  %432 = vrot.lane.b32.xlu1 %v2725_v6, %s2529_s22  ;;  %s2542_s14 = smov 36   ;;  %s2543_s22 = smov 4  }
 0x12a   : > { %382 = vrot.lane.b32.xlu0 %v339_v7, %s2530_s29  ;;  %397 = vrot.lane.b32.xlu1 %v339_v7, %s2531_s6  ;;  %s2544_s29 = smov 8   ;;  %s2545_s6 = smov 12  }
 0x12e   : > { %412 = vrot.lane.b32.xlu0 %v339_v7, %s2532_s8  ;;  %427 = vrot.lane.b32.xlu1 %v339_v7, %s2533_s9  ;;  %s2546_s8 = smov 16   ;;  %s2547_s9 = smov 20  }
 0x132   : > { %442 = vrot.lane.b32.xlu0 %v339_v7, %s2534_s23  ;;  %362 = vrot.lane.b32.xlu1 %v2725_v6, %s2535_s25  ;;  %s2548_s23 = smov 24   ;;  %s2549_s25 = smov 28  }
 0x136   : > { %347 = vrot.lane.b32.xlu0 %v2725_v6, %s2536_s27  ;;  %377 = vrot.lane.b32.xlu1 %v2725_v6, %s2537_s10 }
 0x13a   : > { %392 = vrot.lane.b32.xlu0 %v2725_v6, %s2538_s11  ;;  %407 = vrot.lane.b32.xlu1 %v2725_v6, %s2539_s12  ;;  %s2051_s11 = sshll.u32 %s2503_s18, 7  ;;  %s255_s12 = scalar_lea.vmem [#allocation12], %s2019_s5 }
 0x13b   : > { %s2550_s18 = smov [#allocation12]  }
 0x13c   : > { %s2431_s5 = sshll.u32 %s2550_s18, 4  ;;  %s2432_s5 = int_to_ptr.vmem [resolvable:$false] %s2431_s5 }
 0x13e   : > { %422 = vrot.lane.b32.xlu0 %v2725_v6, %s2540_s24  ;;  %s1910_s24 = sshll.u32 %s255_s12, 4  ;;  %s1911_s24 = int_to_ptr.vmem [resolvable:$true] %s1910_s24 }
 0x13f   : > { %p2434_p2 = scmp.lt.s32.totalorder %s1911_s24, %s2432_s5 }
 0x188   : > { %v373_v9 = vpop.permute.xlu1 %372  ;;  %v344_v10 = vpop.permute.xlu0 %343 }
 0x189   : > { %376 = vst.msk [vmem:[#allocation3 + $0x10] sm:$0xff] %vm340_vm2, %v373_v9  ;;  %346 = vst.msk [vmem:[#allocation3] sm:$0xff] %vm340_vm2, %v344_v10 }
 0x18c   : > { %v388_v11 = vpop.permute.xlu1 %387  ;;  %v358_v12 = vpop.permute.xlu0 %357 }
 0x18d   : > { %391 = vst.msk [vmem:[#allocation3 + $0x18] sm:$0xff] %vm340_vm2, %v388_v11  ;;  %361 = vst.msk [vmem:[#allocation3 + $0x8] sm:$0xff] %vm340_vm2, %v358_v12 }
 0x190   : > { %v418_v13 = vpop.permute.xlu0 %417  ;;  %v353_v14 = vpop.permute.xlu1 %352  ;;  %v467_v15 = vld [vmem:[#allocation3] sm:$0xff]  ;;  %v469_v23 = vld [vmem:[#allocation3 + $0x10] sm:$0xff] }
 0x191   : > { %421 = vst.msk [vmem:[#allocation3 + $0x28] sm:$0xff] %vm340_vm2, %v418_v13  ;;  %356 = vst.msk [vmem:[#allocation2 + $0x8] sm:$0xff] %vm340_vm2, %v353_v14  ;;  %2108 = vmatpush3.xpose.msk.msra.mxu1 %vm340_vm2, %v467_v15 }
 0x192   : > { %2112 = vmatprep.subr.mxu1 %v2518_v0 }
 0x194   : > { %v448_v17 = vpop.permute.xlu0 %447  ;;  %v403_v18 = vpop.permute.xlu1 %402  ;;  %2110 = vmatmul.mubr.msk.f32.vlgmr.msra.gmra.mxu1 %vm340_vm2, %v459_v16  ;;  %v468_v19 = vld [vmem:[#allocation3 + $0x8] sm:$0xff]  ;;  %v470_v30 = vld [vmem:[#allocation3 + $0x18] sm:$0xff] }
 0x195   : > { %451 = vst.msk [vmem:[#allocation3 + $0x38] sm:$0xff] %vm340_vm2, %v448_v17  ;;  %406 = vst.msk [vmem:[#allocation3 + $0x20] sm:$0xff] %vm340_vm2, %v403_v18  ;;  %2113 = vmatpush3.xpose.msk.msra.mxu1 %vm340_vm2, %v468_v19  ;;  %2114 = vmatprep.mubr.msk.f32.mxu1 %vm2519_vm0, %v2518_v0 }
 0x196   : > { %2117 = vmatprep.subr.mxu1 %v2518_v0 }
 0x198   : > { %v368_v20 = vpop.permute.xlu0 %367  ;;  %v433_v21 = vpop.permute.xlu1 %432  ;;  %v460_v22 = vld [vmem:[#allocation2 + $0x8] sm:$0xff] }
 0x199   : > { %371 = vst.msk [vmem:[#allocation2 + $0x10] sm:$0xff] %vm340_vm2, %v368_v20  ;;  %436 = vst.msk [vmem:[#allocation3 + $0x30] sm:$0xff] %vm340_vm2, %v433_v21  ;;  %2115 = vmatmul.mubr.msk.f32.vlgmr.msra.gmra.mxu1 %vm340_vm2, %v460_v22  ;;  %v472_v35 = vld [vmem:[#allocation3 + $0x28] sm:$0xff] }
 0x19a   : > { %2118 = vmatpush3.xpose.msk.msra.mxu1 %vm340_vm2, %v469_v23  ;;  %2119 = vmatprep.mubr.msk.f32.mxu1 %vm2519_vm0, %v2518_v0 }
 0x19b   : > { %2122 = vmatprep.subr.mxu1 %v2518_v0 }
 0x19c   : > { %v383_v24 = vpop.permute.xlu0 %382  ;;  %v398_v25 = vpop.permute.xlu1 %397  ;;  %v471_v26 = vld [vmem:[#allocation3 + $0x20] sm:$0xff]  ;;  %v474_v41 = vld [vmem:[#allocation3 + $0x38] sm:$0xff] }
 0x19d   : > { %386 = vst.msk [vmem:[#allocation2 + $0x18] sm:$0xff] %vm340_vm2, %v383_v24  ;;  %401 = vst.msk [vmem:[#allocation2 + $0x20] sm:$0xff] %vm340_vm2, %v398_v25  ;;  %2128 = vmatpush3.xpose.msk.msra.mxu0 %vm340_vm2, %v471_v26 }
 0x19e   : > { %2137 = vmatprep.subr.mxu0 %v2518_v0 }
 0x1a0   : > { %v413_v27 = vpop.permute.xlu0 %412  ;;  %v428_v28 = vpop.permute.xlu1 %427  ;;  %v461_v29 = vld [vmem:[#allocation2 + $0x10] sm:$0xff] }
 0x1a1   : > { %416 = vst.msk [vmem:[#allocation2 + $0x28] sm:$0xff] %vm340_vm2, %v413_v27  ;;  %431 = vst.msk [vmem:[#allocation2 + $0x30] sm:$0xff] %vm340_vm2, %v428_v28  ;;  %2120 = vmatmul.mubr.msk.f32.vlgmr.msra.gmra.mxu1 %vm340_vm2, %v461_v29  ;;  %v473_v36 = vld [vmem:[#allocation3 + $0x30] sm:$0xff] }
 0x1a2   : > { %2123 = vmatpush3.xpose.msk.msra.mxu1 %vm340_vm2, %v470_v30  ;;  %2124 = vmatprep.mubr.msk.f32.mxu1 %vm2519_vm0, %v2518_v0 }
 0x1a3   : > { %2132 = vmatprep.subr.mxu1 %v2518_v0 }
 0x1a4   : > { %v443_v31 = vpop.permute.xlu0 %442  ;;  %v363_v32 = vpop.permute.xlu1 %362  ;;  %v462_v33 = vld [vmem:[#allocation2 + $0x18] sm:$0xff]  ;;  %v463_v34 = vld [vmem:[#allocation2 + $0x20] sm:$0xff] }
 0x1a5   : > { %446 = vst.msk [vmem:[#allocation2 + $0x38] sm:$0xff] %vm340_vm2, %v443_v31  ;;  %366 = vst.msk [vmem:[#allocation4 + $0x8] sm:$0xff] %vm340_vm2, %v363_v32  ;;  %2125 = vmatmul.mubr.msk.f32.vlgmr.msra.gmra.mxu1 %vm340_vm2, %v462_v33  ;;  %2130 = vmatmul.mubr.msk.f32.vlgmr.msra.gmra.mxu0 %vm340_vm2, %v463_v34 }
 0x1a6   : > { %2133 = vmatpush3.xpose.msk.msra.mxu1 %vm340_vm2, %v472_v35  ;;  %2138 = vmatpush3.xpose.msk.msra.mxu0 %vm340_vm2, %v473_v36 }
 0x1a7   : > { %2139 = vmatprep.mubr.msk.f32.mxu0 %vm2519_vm0, %v2518_v0  ;;  %2134 = vmatprep.mubr.msk.f32.mxu1 %vm2519_vm0, %v2518_v0 }
 0x1a8   : > { %v348_v37 = vpop.permute.xlu0 %347  ;;  %v378_v38 = vpop.permute.xlu1 %377  ;;  %2142 = vmatprep.subr.mxu1 %v2518_v0  ;;  %v464_v39 = vld [vmem:[#allocation2 + $0x28] sm:$0xff]  ;;  %v465_v40 = vld [vmem:[#allocation2 + $0x30] sm:$0xff]  ;;  %2147 = vmatprep.subr.mxu0 %v2518_v0 }
 0x1a9   : > { %350 = vst.msk [vmem:[#allocation4] sm:$0xff] %vm340_vm2, %v348_v37  ;;  %381 = vst.msk [vmem:[#allocation4 + $0x10] sm:$0xff] %vm340_vm2, %v378_v38  ;;  %2135 = vmatmul.mubr.msk.f32.vlgmr.msra.gmra.mxu1 %vm340_vm2, %v464_v39  ;;  %2140 = vmatmul.mubr.msk.f32.vlgmr.msra.gmra.mxu0 %vm340_vm2, %v465_v40 }
 0x1aa   : > { %2143 = vmatpush3.xpose.msk.msra.mxu1 %vm340_vm2, %v474_v41  ;;  %2144 = vmatprep.mubr.msk.f32.mxu1 %vm2519_vm0, %v2518_v0 }
 0x1ab   : > { %2152 = vmatprep.subr.mxu1 %v2518_v0  ;;  %2149 = vmatprep.mubr.msk.f32.mxu0 %vm2519_vm0, %v2518_v0 }
 0x1ac   : > { %v393_v42 = vpop.permute.xlu0 %392  ;;  %v408_v43 = vpop.permute.xlu1 %407  ;;  %v466_v44 = vld [vmem:[#allocation2 + $0x38] sm:$0xff]  ;;  %v476_v45 = vld [vmem:[#allocation4 + $0x8] sm:$0xff] }
 0x1ad   : > { %396 = vst.msk [vmem:[#allocation4 + $0x18] sm:$0xff] %vm340_vm2, %v393_v42  ;;  %411 = vst.msk [vmem:[#allocation4 + $0x20] sm:$0xff] %vm340_vm2, %v408_v43  ;;  %2145 = vmatmul.mubr.msk.f32.vlgmr.msra.gmra.mxu1 %vm340_vm2, %v466_v44 }
 0x1ae   : > { %2153 = vmatpush3.msra.mxu1 %v476_v45  ;;  %2154 = vmatprep.mubr.msk.f32.mxu1 %vm2519_vm0, %v2518_v0 }
 0x1af   : > { %2162 = vmatprep.subr.mxu1 %v2518_v0 }
 0x1b0   : > { %v423_v46 = vpop.permute.xlu0 %422  ;;  %v475_v47 = vld [vmem:[#allocation4] sm:$0xff]  ;;  %v477_v16 = vld [vmem:[#allocation4 + $0x10] sm:$0xff] }
 0x1b1   : > { %426 = vst.msk [vmem:[#allocation4 + $0x28] sm:$0xff] %vm340_vm2, %v423_v46  ;;  %2148 = vmatpush3.msra.mxu0 %v475_v47 }
 0x1b2   : > { %2157 = vmatprep.subr.mxu0 %v2518_v0 }
 0x1b4   : > { %v478_v38 = vld [vmem:[#allocation4 + $0x18] sm:$0xff]  ;;  %v479_v47 = vld [vmem:[#allocation4 + $0x20] sm:$0xff] }
 0x1b8   : > { %v480_v42 = vld [vmem:[#allocation4 + $0x28] sm:$0xff] }
 0x254   : > { %v556_v48 = vpop.f32.mrf.mxu1 }
 0x255   : > { %v1093_v49 = vsel %vm1092_vm3, %v556_v48, -inf }
 0x256   : > { %1094 = vmax.xlane.f32.xlu1 %v1093_v49  ;;  %v2111_v50 = vpop.f32.mrf.mxu1 }
 0x259   : > { %v632_v51 = vpop.f32.mrf.mxu1 }
 0x25a   : > { %v1096_v1 = vsel %vm1092_vm3, %v632_v51, -inf }
 0x25b   : > { %v2116_v52 = vpop.f32.mrf.mxu1 }
 0x261   : > { %v2807_v53 = vpop.f32.mrf.mxu1 }
 0x262   : > { %v1099_v9 = vsel %vm1092_vm3, %v2807_v53, -inf }
 0x263   : > { %v2121_v54 = vpop.f32.mrf.mxu1 }
 0x265   : > { %v784_v55 = vpop.f32.mrf.mxu1  ;;  %v860_v56 = vpop.f32.mrf.mxu0 }
 0x266   : > { %v1102_v57 = vsel %vm1092_vm3, %v784_v55, -inf  ;;  %v1105_v58 = vsel %vm1092_vm3, %v860_v56, -inf }
 0x267   : > { %1103 = vmax.xlane.f32.xlu1 %v1102_v57  ;;  %v2126_v59 = vpop.f32.mrf.mxu1  ;;  %1106 = vmax.xlane.f32.xlu0 %v1105_v58  ;;  %v2131_v60 = vpop.f32.mrf.mxu0 }
 0x269   : > { %v936_v61 = vpop.f32.mrf.mxu1  ;;  %v1012_v62 = vpop.f32.mrf.mxu0 }
 0x26a   : > { %v1108_v63 = vsel %vm1092_vm3, %v936_v61, -inf  ;;  %v1111_v7 = vsel %vm1092_vm3, %v1012_v62, -inf }
 0x26b   : > { %1109 = vmax.xlane.f32.xlu1 %v1108_v63  ;;  %v2136_v2 = vpop.f32.mrf.mxu1  ;;  %1097 = vmax.xlane.f32.xlu0 %v1096_v1  ;;  %v2141_v3 = vpop.f32.mrf.mxu0 }
 0x26d   : > { %v1088_v4 = vpop.f32.mrf.mxu1 }
 0x26e   : > { %v1114_v5 = vsel %vm1092_vm3, %v1088_v4, -inf }
 0x26f   : > { %1115 = vmax.xlane.f32.xlu1 %v1114_v5  ;;  %v2146_v8 = vpop.f32.mrf.mxu1  ;;  %1112 = vmax.xlane.f32.xlu0 %v1111_v7 }
 0x273   : > { %1100 = vmax.xlane.f32.xlu0 %v1099_v9 }
 0x280   : > { %437 = vrot.lane.b32.xlu1 %v2725_v6, %s2541_s13 }
 0x289   : > { %452 = vrot.lane.b32.xlu0 %v2725_v6, %s2542_s14 }
 0x2df   : > { %v1095_v10 = vpop.xlane.xlu1 %1094 }
 0x2e0   : > { %v1117_v11 = vsub.f32 %v556_v48, %v1095_v10 }
 0x2e2   : > { %v1125_v12 = vmul.f32 1.442695, %v1117_v11 }
 0x2e4   : > { %2315 = vpow2.f32 %v1125_v12 }
 0x2f0   : > { %v1104_v13 = vpop.xlane.xlu1 %1103  ;;  %v1107_v14 = vpop.xlane.xlu0 %1106 }
 0x2f1   : > { %v2819_v15 = vpop.eup %2315  ;;  %v1121_v17 = vsub.f32 %v860_v56, %v1107_v14  ;;  %v1120_v20 = vsub.f32 %v784_v55, %v1104_v13 }
 0x2f2   : > { %2150 = vmatmul.mubr.msk.f32.vlgmr.msra.gmra.mxu0 %vm1092_vm3, %v2819_v15 }
 0x2f3   : > { %2158 = vmatpush3.msra.mxu0 %v477_v16  ;;  %2159 = vmatprep.mubr.msk.f32.mxu0 %vm2519_vm0, %v2518_v0  ;;  %v1133_v22 = vmul.f32 1.442695, %v1121_v17  ;;  %v1131_v26 = vmul.f32 1.442695, %v1120_v20 }
 0x2f4   : > { %v1110_v18 = vpop.xlane.xlu1 %1109  ;;  %v1098_v19 = vpop.xlane.xlu0 %1097  ;;  %2167 = vmatprep.subr.mxu0 %v2518_v0 }
 0x2f5   : > { %v1118_v6 = vsub.f32 %v632_v51, %v1098_v19  ;;  %v1122_v27 = vsub.f32 %v936_v61, %v1110_v18  ;;  %v1812_v18 = vld [vmem:[#allocation11 + $0x18] sm:$0xff]  ;;  %v1811_v19 = vld [vmem:[#allocation11 + $0x10] sm:$0xff] }
 0x2f7   : > { %v1127_v21 = vmul.f32 1.442695, %v1118_v6  ;;  %v1135_v32 = vmul.f32 1.442695, %v1122_v27  ;;  %v1809_v27 = vld [vmem:[#allocation11] sm:$0xff] }
 0x2f8   : > { %v1116_v23 = vpop.xlane.xlu1 %1115  ;;  %v1113_v24 = vpop.xlane.xlu0 %1112 }
 0x2f9   : > { %v1123_v25 = vsub.f32 %v1012_v62, %v1113_v24  ;;  %2317 = vpow2.f32 %v1127_v21  ;;  %v1124_v33 = vsub.f32 %v1088_v4, %v1116_v23  ;;  %v1810_v21 = vld [vmem:[#allocation11 + $0x8] sm:$0xff] }
 0x2fa   : > { %2319 = vpow2.f32 %v1133_v22 }
 0x2fb   : > { %v1137_v28 = vmul.f32 1.442695, %v1123_v25  ;;  %2321 = vpow2.f32 %v1131_v26  ;;  %v1139_v36 = vmul.f32 1.442695, %v1124_v33 }
 0x2fc   : > { %v438_v29 = vpop.permute.xlu1 %437  ;;  %v1101_v30 = vpop.xlane.xlu0 %1100 }
 0x2fd   : > { %441 = vst.msk [vmem:[#allocation4 + $0x30] sm:$0xff] %vm340_vm2, %v438_v29  ;;  %v1119_v31 = vsub.f32 %v2807_v53, %v1101_v30  ;;  %2323 = vpow2.f32 %v1137_v28  ;;  %v1141_v53 = vsel %vm1092_vm3, %v2819_v15, 0.0 }
 0x2ff   : > { %v1129_v34 = vmul.f32 1.442695, %v1119_v31 }
 0x300   : > { %v453_v35 = vpop.permute.xlu0 %452 }
 0x301   : > { %2325 = vpow2.f32 %v1129_v34  ;;  %456 = vst.msk [vmem:[#allocation4 + $0x38] sm:$0xff] %vm340_vm2, %v453_v35 }
 0x302   : > { %2327 = vpow2.f32 %v1135_v32 }
 0x303   : > { %2329 = vpow2.f32 %v1139_v36 }
 0x304   : > { %v481_v52 = vld [vmem:[#allocation4 + $0x30] sm:$0xff] }
 0x306   : > { %v2318_v37 = vpop.eup %2317 }
 0x307   : > { %2155 = vmatmul.mubr.msk.f32.vlgmr.msra.gmra.mxu1 %vm1092_vm3, %v2318_v37  ;;  %v1144_v39 = vsel %vm1092_vm3, %v2318_v37, 0.0  ;;  %v2320_v40 = vpop.eup %2319 }
 0x308   : > { %2163 = vmatpush3.msra.mxu1 %v478_v38  ;;  %1145 = vadd.xlane.f32.xlu1 %v1144_v39  ;;  %v2322_v41 = vpop.eup %2321  ;;  %v1153_v43 = vsel %vm1092_vm3, %v2320_v40, 0.0  ;;  %v482_v49 = vld [vmem:[#allocation4 + $0x38] sm:$0xff] }
 0x309   : > { %2164 = vmatprep.mubr.msk.f32.mxu1 %vm2519_vm0, %v2518_v0  ;;  %2172 = vmatprep.subr.mxu1 %v2518_v0  ;;  %v1150_v54 = vsel %vm1092_vm3, %v2322_v41, 0.0 }
 0x30a   : > { %v2324_v44 = vpop.eup %2323 }
 0x30b   : > { %2165 = vmatmul.mubr.msk.f32.vlgmr.msra.gmra.mxu1 %vm1092_vm3, %v2322_v41  ;;  %v1159_v50 = vsel %vm1092_vm3, %v2324_v44, 0.0 }
 0x30c   : > { %2173 = vmatpush3.msra.mxu1 %v480_v42  ;;  %1154 = vadd.xlane.f32.xlu1 %v1153_v43 }
 0x30d   : > { %2174 = vmatprep.mubr.msk.f32.mxu1 %vm2519_vm0, %v2518_v0  ;;  %2182 = vmatprep.subr.mxu1 %v2518_v0 }
 0x30e   : > { %v2326_v45 = vpop.eup %2325 }
 0x30f   : > { %v2328_v46 = vpop.eup %2327  ;;  %2160 = vmatmul.mubr.msk.f32.vlgmr.msra.gmra.mxu0 %vm1092_vm3, %v2326_v45  ;;  %v1147_v48 = vsel %vm1092_vm3, %v2326_v45, 0.0  ;;  %v2048_v45 = vld [vmem:[%s2921_s3] ss:$0 sm:$0xff] }
 0x310   : > { %2168 = vmatpush3.msra.mxu0 %v479_v47  ;;  %2175 = vmatmul.mubr.msk.f32.vlgmr.msra.gmra.mxu1 %vm1092_vm3, %v2328_v46  ;;  %v2330_v51 = vpop.eup %2329  ;;  %v1156_v55 = vsel %vm1092_vm3, %v2328_v46, 0.0 }
 0x311   : > { %2183 = vmatpush3.msra.mxu1 %v482_v49  ;;  %1160 = vadd.xlane.f32.xlu1 %v1159_v50  ;;  %v1162_v56 = vsel %vm1092_vm3, %v2330_v51, 0.0 }
 0x312   : > { %1148 = vadd.xlane.f32.xlu0 %v1147_v48  ;;  %2169 = vmatprep.mubr.msk.f32.mxu0 %vm2519_vm0, %v2518_v0 }
 0x313   : > { %2177 = vmatprep.subr.mxu0 %v2518_v0  ;;  %2184 = vmatprep.mubr.msk.f32.mxu1 %vm2519_vm0, %v2518_v0 }
 0x314   : > { %2170 = vmatmul.mubr.msk.f32.vlgmr.msra.gmra.mxu0 %vm1092_vm3, %v2320_v40  ;;  %2185 = vmatmul.mubr.msk.f32.vlgmr.msra.gmra.mxu1 %vm1092_vm3, %v2330_v51 }
 0x315   : > { %2178 = vmatpush3.msra.mxu0 %v481_v52  ;;  %1142 = vadd.xlane.f32.xlu1 %v1141_v53 }
 0x316   : > { %1151 = vadd.xlane.f32.xlu0 %v1150_v54  ;;  %2179 = vmatprep.mubr.msk.f32.mxu0 %vm2519_vm0, %v2518_v0 }
 0x317   : > { %2187 = vmatprep.subr.mxu0 %v2518_v0 }
 0x318   : > { %2180 = vmatmul.mubr.msk.f32.vlgmr.msra.gmra.mxu0 %vm1092_vm3, %v2324_v44 }
 0x319   : > { %2195 = vmatprep.mubr.msk.f32.mxu0 %vm2519_vm0, %v2518_v0  ;;  %2188 = vmatpush3.msra.mxu0 %v1812_v18 }
 0x31a   : > { %1157 = vadd.xlane.f32.xlu0 %v1156_v55  ;;  %2189 = vmatprep.subr.mxu0 %v2518_v0 }
 0x31b   : > { %2190 = vmatpush3.msra.mxu0 %v1811_v19 }
 0x31c   : > { %2191 = vmatprep.subr.mxu0 %v2518_v0 }
 0x31d   : > { %2192 = vmatpush3.msra.mxu0 %v1810_v21 }
 0x31e   : > { %1163 = vadd.xlane.f32.xlu0 %v1162_v56  ;;  %2193 = vmatprep.subr.mxu0 %v2518_v0 }
 0x31f   : > { %2194 = vmatpush3.msra.mxu0 %v1809_v27 }
 0x391   : > { %v1146_v57 = vpop.xlane.xlu1 %1145 }
 0x395   : > { %v1155_v58 = vpop.xlane.xlu1 %1154 }
 0x39a   : > { %v1161_v59 = vpop.xlane.xlu1 %1160 }
 0x39b   : > { %v1149_v2 = vpop.xlane.xlu0 %1148 }
 0x39e   : > { %v1143_v60 = vpop.xlane.xlu1 %1142 }
 0x39f   : > { %2331 = vrcp.f32 %v1143_v60  ;;  %v1152_v3 = vpop.xlane.xlu0 %1151 }
 0x3a0   : > { %2333 = vrcp.f32 %v1146_v57 }
 0x3a1   : > { %2335 = vrcp.f32 %v1149_v2 }
 0x3a2   : > { %2337 = vrcp.f32 %v1152_v3 }
 0x3a3   : > { %v1158_v4 = vpop.xlane.xlu0 %1157  ;;  %2339 = vrcp.f32 %v1155_v58 }
 0x3a4   : > { %2341 = vrcp.f32 %v1158_v4 }
 0x3a5   : > { %2343 = vrcp.f32 %v1161_v59 }
 0x3a7   : > { %v1164_v10 = vpop.xlane.xlu0 %1163 }
 0x3a8   : > { %2345 = vrcp.f32 %v1164_v10 }
 0x3ac   : > { %v2332_v61 = vpop.eup %2331 }
 0x3ad   : > { %v2334_v5 = vpop.eup %2333 }
 0x3ae   : > { %v2336_v13 = vpop.eup %2335 }
 0x3af   : > { %v2338_v20 = vpop.eup %2337 }
 0x3b0   : > { %v2340_v22 = vpop.eup %2339 }
 0x3b1   : > { %v2342_v30 = vpop.eup %2341 }
 0x3b2   : > { %v1234_v62 = vpop.f32.mrf.mxu0  ;;  %v2344_v31 = vpop.eup %2343 }
 0x3b3   : > { %v1757_v63 = vmul.f32 %v2332_v61, %v1234_v62 }
 0x3b4   : > { %v2151_v1 = vpop.f32.mrf.mxu0 }
 0x3b5   : > { %1765 = vst.msk [vmem:[#allocation5] sm:$0xff] %vm340_vm2, %v1757_v63  ;;  %v2346_v36 = vpop.eup %2345 }
 0x3c7   : > { %v1307_v7 = vpop.f32.mrf.mxu1 }
 0x3c8   : > { %v1758_v8 = vmul.f32 %v2334_v5, %v1307_v7 }
 0x3c9   : > { %v2156_v9 = vpop.f32.mrf.mxu1 }
 0x3ca   : > { %1767 = vrot.lane.b32.xlu0 %v1758_v8, %s2543_s22  ;;  %s2875_s22 = scalar_lea.hbm %s2922_s4, %s2051_s11 }
 0x3cb   : > { %v1453_v11 = vpop.f32.mrf.mxu1 }
 0x3cc   : > { %v1760_v23 = vmul.f32 %v2338_v20, %v1453_v11 }
 0x3cd   : > { %v2166_v12 = vpop.f32.mrf.mxu1 }
 0x3cf   : > { %v1380_v14 = vpop.f32.mrf.mxu0 }
 0x3d0   : > { %v1759_v15 = vmul.f32 %v2336_v13, %v1380_v14  ;;  %v1599_v16 = vpop.f32.mrf.mxu1 }
 0x3d1   : > { %v2161_v17 = vpop.f32.mrf.mxu0  ;;  %v1762_v32 = vmul.f32 %v2342_v30, %v1599_v16 }
 0x3d2   : > { %v2176_v6 = vpop.f32.mrf.mxu1  ;;  %1773 = vrot.lane.b32.xlu1 %v1759_v15, %s2544_s29  ;;  %s1896_s29 = scalar_lea.sflag [#allocation8], %s2698_s30 }
 0x3d4   : > { %v1526_v24 = vpop.f32.mrf.mxu0  ;;  %v1745_v25 = vpop.f32.mrf.mxu1 }
 0x3d5   : > { %v1761_v26 = vmul.f32 %v2340_v22, %v1526_v24  ;;  %v1764_v37 = vmul.f32 %v2346_v36, %v1745_v25 }
 0x3d6   : > { %v2171_v28 = vpop.f32.mrf.mxu0  ;;  %v2186_v29 = vpop.f32.mrf.mxu1  ;;  %1779 = vrot.lane.b32.xlu1 %v1760_v23, %s2545_s6  ;;  %s2427_s6 = scalar_lea.vmem %s1911_s24, 128 }
 0x3d7   : > { %1785 = vrot.lane.b32.xlu0 %v1761_v26, %s2546_s8  ;;  %p2428_p8 = scmp.ne.s32.totalorder %s1911_s24, %s2427_s6  ;;  %s2433_s8 = scalar_lea.vmem %s2432_s5, 256 }
 0x3d8   : > { %v1672_v33 = vpop.f32.mrf.mxu0  ;;  %p2435_p13 = scmp.lt.s32.totalorder %s2433_s8, %s2427_s6 }
 0x3d9   : > { %v1763_v34 = vmul.f32 %v2344_v31, %v1672_v33  ;;  %p2429_p9 = pnand %p2428_p8, %p2671_p7 }
 0x3da   : > { %v2181_v35 = vpop.f32.mrf.mxu0  ;;  %1791 = vrot.lane.b32.xlu1 %v1762_v32, %s2547_s9  ;;  %p2436_p0 = por %p2435_p13, %p2434_p2 }
 0x3db   : > { %1797 = vrot.lane.b32.xlu0 %v1763_v34, %s2548_s23  ;;  %p2430_p11 = pneg %p2429_p9 }
 0x3dd   : > { %p2437_p5 = pnand %p2436_p0, %p2430_p11 }
 0x3de   : > { %1803 = vrot.lane.b32.xlu1 %v1764_v37, %s2549_s25 }
 0x43c   : > { %v1768_v38 = vpop.permute.xlu0 %1767 }
 0x43d   : > { %1771 = vst.msk [vmem:[#allocation5] sm:$0xff] %vm1770_vm4, %v1768_v38 }
 0x444   : > { %v1774_v39 = vpop.permute.xlu1 %1773 }
 0x445   : > { %1777 = vst.msk [vmem:[#allocation5] sm:$0xff] %vm1776_vm5, %v1774_v39 }
 0x448   : > { %v1780_v0 = vpop.permute.xlu1 %1779 }
 0x449   : > { %1783 = vst.msk [vmem:[#allocation5] sm:$0xff] %vm1782_vm6, %v1780_v0  ;;  %v1786_v40 = vpop.permute.xlu0 %1785 }
 0x44a   : > { %1789 = vst.msk [vmem:[#allocation5] sm:$0xff] %vm1788_vm7, %v1786_v40 }
 0x44c   : > { %v1792_v41 = vpop.permute.xlu1 %1791 }
 0x44d   : > { %1795 = vst.msk [vmem:[#allocation5] sm:$0xff] %vm1794_vm8, %v1792_v41  ;;  %v1798_v42 = vpop.permute.xlu0 %1797 }
 0x44e   : > { %1801 = vst.msk [vmem:[#allocation5] sm:$0xff] %vm1800_vm9, %v1798_v42 }
 0x450   : > { %v1804_v43 = vpop.permute.xlu1 %1803 }
 0x451   : > { %1807 = vst.msk [vmem:[#allocation5] sm:$0xff] %vm1806_vm10, %v1804_v43 }
 0x458   : > { %v1808_v44 = vld [vmem:[#allocation5] sm:$0xff] }
 0x459   : > { %2196 = vmatmul.mubr.msk.f32.vlgmr.msra.gmra.mxu0 %vm265_vm1, %v1808_v44 }
 0x519   : > { %v1890_v46 = vpop.f32.mrf.mxu0 }
 0x51a   : > { %v1891_v47 = vadd.f32 %v2048_v45, %v1890_v46 }
 0x51b   : > { %v2197_v48 = vpop.f32.mrf.mxu0 }
 0x51c   : > { %1894 = vst.msk [vmem:[%s255_s12] sm:$0xff] %vm265_vm1, %v1891_v47 }
 0x51d   : > { %2440 = shalt.err (!%p2437_p5)
}
 0x51e   : > { %s2441_s9 = scalar_lea.hbm %s2875_s22, 128  ;;  %s2445_s25 = scalar_lea.hbm %s2922_s4, 256 }
 0x51f   : > { %p2442_p10 = scmp.ne.s32.totalorder %s2875_s22, %s2441_s9  ;;  %p2446_p6 = scmp.lt.s32.totalorder %s2875_s22, %s2922_s4 }
 0x520   : > { %p2447_p12 = scmp.lt.s32.totalorder %s2445_s25, %s2441_s9 }
 0x521   : > { %p2443_p1 = pnand %p2442_p10, %p2671_p7 }
 0x522   : > { %p2448_p3 = por %p2447_p12, %p2446_p6 }
 0x523   : > { %p2444_p4 = pneg %p2443_p1 }
 0x525   : > { %p2449_p8 = pnand %p2448_p3, %p2444_p4 }
 0x527   : > { %2452 = shalt.err (!%p2449_p8)
}
 0x528   : > { %2208 = dma.vmem_to_hbm [thread:$0]  (%p2671_p7), %s1911_s24, 128, %s2875_s22, %s1896_s29  }
 0x529 PF: > { %s1922_s11 = sand.u32 1, %s2491_s15   ;;  %p2936_p9 = scmp.ne.s32.totalorder %s2929_s26, 0 }
 0x52a   : > { %p2937_p11 = scmp.ge.s32.totalorder %s2511_s20, 2  ;;  %s1923_s12 = scalar_lea.sflag [#allocation8], %s1922_s11 }
 0x52c   : > { %p2222_p2 = pnand %p2937_p11, %p2936_p9 }
 0x52e   : > { %p2223_p13 = pneg %p2222_p2 }
 0x530   : > { %2486 = dma.done.wait (%p2223_p13), %s1923_s12, 128  }
 0x531   : > { %2488 = vsyncadd (%p2223_p13), %s1923_s12, 4294967168  ;;  %s21_s20 = sadd.s32 1, %s2511_s20   ;;  %s2938_s15 = smov %s2495_s16 }
 0x532   : > { %p18_p0 = scmp.ge.s32.totalorder %s21_s20, 4   ;;  %s2939_s16 = smov %s2499_s17 }
 0x533   : > { %s2940_s17 = smov %s2680_s7  ;;  %s2941_s18 = smov %s2507_s19 }
 0x534   : > { %s2942_s19 = smov %s2944_s21  ;;  %20 = sbr.rel (!%p18_p0) target bundleno = 7 (0x7), region = 115 }
 0x539   :  { %1928 = vsyncpa [#allocation7], 1 }
 0x53a   :  { %1930 = vsyncpa [#allocation7 + $0x1], 1 }
 0x53b   :  { %1931 = vsyncpa [#allocation10], 1 }
 0x53c   :  { %1932 = vsyncpa [#allocation8], 1 }
 0x53d   :  { %1934 = vsyncpa [#allocation8 + $0x1], 1 }

</bundles_post_ra>
